<compile_context>
chip_gen: v7x
topology: tpu7x:2x2x1
jax: 0.10.0
libtpu: 0.0.40
codegen_flags: <defaults>
</compile_context>

<pallas_src>
import functools
import math

import jax
import jax.numpy as jnp
from jax import lax
from jax.experimental import pallas as pl
from jax.experimental.pallas import tpu as pltpu

# ----------------------------- small config (synthetic) -----------------------------
B = 2          # batch
L = 8          # sequence length (stands in for maxlen=256)
H = 32         # hidden size (stands in for 768)
NH = 4         # attention heads
DH = H // NH   # head dim
FF = 64        # FFN intermediate size
LAYERS = 2     # encoder layers
VOCAB = 100
TYPES = 2
C = 4          # c_size = number of entity classes

F32 = jnp.float32
BF16 = jnp.bfloat16


def _row_tile(M):
    """Largest row tile <= 256 that divides M with >= 2 grid steps (megacore)."""
    for tm in (256, 128, 64, 32, 16, 8):
        if M % tm == 0 and M // tm >= 2:
            return tm
    return M


# ----------------------------- Pallas kernels -----------------------------

def _dense_kernel(x_ref, w_ref, b_ref, o_ref, *, gelu):
    acc = jnp.dot(x_ref[...].astype(BF16), w_ref[...], preferred_element_type=F32)
    acc = acc + b_ref[...]
    if gelu:
        # TODO(synk): HF BERT uses exact (erf) GELU; tanh approximation used here for
        # guaranteed Mosaic lowering of the transcendental.
        acc = 0.5 * acc * (1.0 + jnp.tanh(0.7978845608028654 *
                                          (acc + 0.044715 * acc * acc * acc)))
    o_ref[...] = acc.astype(o_ref.dtype)


def dense(x2d, w, b, *, gelu=False):
    """x2d: (M, K) f32 @ w: (K, N) bf16 + b: (N,) f32, optional fused GELU."""
    M, K = x2d.shape
    N = w.shape[1]
    tm = _row_tile(M)
    # TODO(synk): at real shapes (K=768, N=3072) tile N over the grid / set
    # vmem_limit_bytes so the full weight block fits v5e/v7x scoped VMEM.
    return pl.pallas_call(
        functools.partial(_dense_kernel, gelu=gelu),
        out_shape=jax.ShapeDtypeStruct((M, N), F32),
        grid=(M // tm,),
        in_specs=[
            pl.BlockSpec((tm, K), lambda i: (i, 0)),
            pl.BlockSpec((K, N), lambda i: (0, 0)),
            pl.BlockSpec((1, N), lambda i: (0, 0)),
        ],
        out_specs=pl.BlockSpec((tm, N), lambda i: (i, 0)),
        compiler_params=pltpu.CompilerParams(dimension_semantics=("parallel",)),
    )(x2d, w, b.reshape(1, N))


def _dense_add_ln_kernel(x_ref, w_ref, b_ref, r_ref, g_ref, be_ref, o_ref, *, eps):
    acc = jnp.dot(x_ref[...].astype(BF16), w_ref[...], preferred_element_type=F32)
    h = acc + b_ref[...] + r_ref[...]
    mu = jnp.mean(h, axis=-1, keepdims=True)
    var = jnp.mean((h - mu) ** 2, axis=-1, keepdims=True)
    y = (h - mu) * lax.rsqrt(var + eps)
    o_ref[...] = (y * g_ref[...] + be_ref[...]).astype(o_ref.dtype)


def dense_add_ln(x2d, w, b, res2d, gamma, beta, eps=1e-12):
    """Fused: (x2d @ w + b) + residual, then LayerNorm. N must equal H."""
    M, K = x2d.shape
    N = w.shape[1]
    tm = _row_tile(M)
    return pl.pallas_call(
        functools.partial(_dense_add_ln_kernel, eps=eps),
        out_shape=jax.ShapeDtypeStruct((M, N), F32),
        grid=(M // tm,),
        in_specs=[
            pl.BlockSpec((tm, K), lambda i: (i, 0)),
            pl.BlockSpec((K, N), lambda i: (0, 0)),
            pl.BlockSpec((1, N), lambda i: (0, 0)),
            pl.BlockSpec((tm, N), lambda i: (i, 0)),
            pl.BlockSpec((1, N), lambda i: (0, 0)),
            pl.BlockSpec((1, N), lambda i: (0, 0)),
        ],
        out_specs=pl.BlockSpec((tm, N), lambda i: (i, 0)),
        compiler_params=pltpu.CompilerParams(dimension_semantics=("parallel",)),
    )(x2d, w, b.reshape(1, N), res2d, gamma.reshape(1, N), beta.reshape(1, N))


def _ln_kernel(x_ref, g_ref, b_ref, o_ref, *, eps):
    h = x_ref[...]
    mu = jnp.mean(h, axis=-1, keepdims=True)
    var = jnp.mean((h - mu) ** 2, axis=-1, keepdims=True)
    y = (h - mu) * lax.rsqrt(var + eps)
    o_ref[...] = (y * g_ref[...] + b_ref[...]).astype(o_ref.dtype)


def layernorm(x2d, gamma, beta, eps=1e-12):
    """Row-tiled LayerNorm with no residual (used for the embeddings)."""
    M, Hd = x2d.shape
    tm = _row_tile(M)
    return pl.pallas_call(
        functools.partial(_ln_kernel, eps=eps),
        out_shape=jax.ShapeDtypeStruct((M, Hd), F32),
        grid=(M // tm,),
        in_specs=[
            pl.BlockSpec((tm, Hd), lambda i: (i, 0)),
            pl.BlockSpec((1, Hd), lambda i: (0, 0)),
            pl.BlockSpec((1, Hd), lambda i: (0, 0)),
        ],
        out_specs=pl.BlockSpec((tm, Hd), lambda i: (i, 0)),
        compiler_params=pltpu.CompilerParams(dimension_semantics=("parallel",)),
    )(x2d, gamma.reshape(1, Hd), beta.reshape(1, Hd))


def _attn_kernel(q_ref, k_ref, v_ref, bias_ref, o_ref, *, scale):
    q = q_ref[0].astype(BF16)          # (NH, L, DH)
    k = k_ref[0].astype(BF16)          # (NH, L, DH)
    v = v_ref[0].astype(BF16)          # (NH, L, DH)
    # scores for all heads at once: (NH, L, L)
    s = jnp.einsum('hqd,hkd->hqk', q, k, preferred_element_type=F32) * scale
    s = s + bias_ref[0]                # (1, L) broadcasts over heads and query rows
    m = jnp.max(s, axis=-1, keepdims=True)
    e = jnp.exp(s - m)
    p = e * pl.reciprocal(jnp.sum(e, axis=-1, keepdims=True), approx=True)
    ctx = jnp.einsum('hqk,hkd->hqd', p.astype(BF16), v, preferred_element_type=F32)
    o_ref[0] = ctx.astype(o_ref.dtype)


def attention(q, k, v, bias, scale):
    """q/k/v: (B, NH, L, DH); bias: (B, 1, L) additive mask (shared by all heads)."""
    Bb, Hh, Ls, Dh = q.shape
    spec = pl.BlockSpec((1, Hh, Ls, Dh), lambda b: (b, 0, 0, 0))
    return pl.pallas_call(
        functools.partial(_attn_kernel, scale=scale),
        out_shape=jax.ShapeDtypeStruct((Bb, Hh, Ls, Dh), F32),
        grid=(Bb,),
        in_specs=[spec, spec, spec,
                  pl.BlockSpec((1, 1, Ls), lambda b: (b, 0, 0))],
        out_specs=spec,
        compiler_params=pltpu.CompilerParams(dimension_semantics=("parallel",)),
    )(q, k, v, bias)


def _biaffine_kernel(h_ref, m_ref, w_ref, b2_ref, o_ref, *, n_out, hidden):
    h = h_ref[0]                        # (L, H) f32, already position-augmented
    hb = h.astype(BF16)
    mask_row = m_ref[0]                 # (1, L) -> masks the y (column) axis
    mask_col = jnp.transpose(mask_row)  # (L, 1) -> masks the x (row) axis
    Ls = h.shape[0]
    neg = jnp.float32(-1e12)

    # One fused matmul: [bilinear-left | concat-linear-x | concat-linear-y]
    big = jnp.dot(hb, w_ref[...], preferred_element_type=F32)   # (L, C*H + 2C)
    p = big[:, n_out * hidden:n_out * hidden + n_out]           # (L, C)  h[x].W2[:H]
    q = big[:, n_out * hidden + n_out:]                         # (L, C)  h[y].W2[H:2H]

    row = lax.broadcasted_iota(jnp.int32, (Ls, Ls), 0)
    col = lax.broadcasted_iota(jnp.int32, (Ls, Ls), 1)
    tril_pen = jnp.where(row > col, jnp.float32(1e12), jnp.float32(0.0))

    # TODO(synk): at real shapes pad L to a multiple of 128 so the (L, L) class
    # slabs are lane-dense stores.
    for o in range(n_out):
        a = big[:, o * hidden:(o + 1) * hidden]                 # (L, H) = h @ W1[:,o,:]
        s = lax.dot_general(a.astype(BF16), hb, (((1,), (1,)), ((), ())),
                            preferred_element_type=F32)         # (L, L)
        s = s + p[:, o:o + 1] + jnp.transpose(q[:, o:o + 1]) + b2_ref[:, o:o + 1]
        # sequence masking (value '-inf' == -1e12), x axis then y axis
        s = s * mask_col + neg * (1.0 - mask_col)
        s = s * mask_row + neg * (1.0 - mask_row)
        # exclude strict lower triangle (x > y)
        s = s - tril_pen
        o_ref[0, o] = s.astype(o_ref.dtype)


def biaffine_head(hidden, mask, w_big, w2_bias):
    """hidden: (B, L, H); mask: (B, L) 0/1; w_big: (H, C*H + 2C) bf16; w2_bias: (1, C)."""
    Bb, Ls, Hd = hidden.shape
    Cc = w2_bias.shape[1]
    mask3 = mask.reshape(Bb, 1, Ls).astype(F32)
    return pl.pallas_call(
        functools.partial(_biaffine_kernel, n_out=Cc, hidden=Hd),
        out_shape=jax.ShapeDtypeStruct((Bb, Cc, Ls, Ls), F32),
        grid=(Bb,),
        in_specs=[
            pl.BlockSpec((1, Ls, Hd), lambda b: (b, 0, 0)),
            pl.BlockSpec((1, 1, Ls), lambda b: (b, 0, 0)),
            pl.BlockSpec(w_big.shape, lambda b: (0, 0)),
            pl.BlockSpec((1, Cc), lambda b: (0, 0)),
        ],
        out_specs=pl.BlockSpec((1, Cc, Ls, Ls), lambda b: (b, 0, 0, 0)),
        compiler_params=pltpu.CompilerParams(dimension_semantics=("parallel",)),
    )(hidden, mask3, w_big, w2_bias)


# ----------------------------- plain-JAX glue -----------------------------

def sinusoidal_position_embedding(seq_len, dim):
    pos = jnp.arange(seq_len, dtype=F32)[:, None]
    idx = jnp.arange(dim // 2, dtype=F32)
    inv = jnp.power(10000.0, -2.0 * idx / dim)
    ang = pos * inv[None, :]
    emb = jnp.stack([jnp.sin(ang), jnp.cos(ang)], axis=-1)   # (L, dim/2, 2) interleaved
    return emb.reshape(seq_len, dim)


def init_params(key):
    keys = iter(jax.random.split(key, 16 + LAYERS * 16))

    def nrm(shape, std=0.02):
        return (std * jax.random.normal(next(keys), shape)).astype(F32)

    params = {
        "word_emb": nrm((VOCAB, H)),
        "pos_emb": nrm((L, H)),
        "type_emb": nrm((TYPES, H)),
        "emb_ln_g": jnp.ones((H,), F32),
        "emb_ln_b": jnp.zeros((H,), F32),
        "layers": [],
    }

    # Biaffine head parameters, fused into one lane-dense weight:
    #   W_big = [ W1 reshaped (H, C*H) | W2[:H] (H, C) | W2[H:2H] (H, C) ]
    w1 = nrm((H, C, H), std=1.0 / math.sqrt(H))
    w2 = nrm((2 * H + 1, C), std=1.0 / math.sqrt(2 * H + 1))
    params["bi_w"] = jnp.concatenate(
        [w1.reshape(H, C * H), w2[:H, :], w2[H:2 * H, :]], axis=1).astype(BF16)
    params["bi_b"] = w2[2 * H:2 * H + 1, :]                      # (1, C) f32

    for _ in range(LAYERS):
        wq, wk, wv = nrm((H, H)), nrm((H, H)), nrm((H, H))
        params["layers"].append({
            "wqkv": jnp.concatenate([wq, wk, wv], axis=1).astype(BF16),  # (H, 3H)
            "bqkv": jnp.zeros((3 * H,), F32),
            "wo": nrm((H, H)).astype(BF16), "bo": jnp.zeros((H,), F32),
            "ln1_g": jnp.ones((H,), F32), "ln1_b": jnp.zeros((H,), F32),
            "w1": nrm((H, FF)).astype(BF16), "b1": jnp.zeros((FF,), F32),
            "w2": nrm((FF, H)).astype(BF16), "b2": jnp.zeros((H,), F32),
            "ln2_g": jnp.ones((H,), F32), "ln2_b": jnp.zeros((H,), F32),
        })
    return params


def split_heads(x2d):
    # (B*L, H) -> (B, NH, L, DH)
    return x2d.reshape(B, L, NH, DH).transpose(0, 2, 1, 3)


def merge_heads(x4d):
    # (B, NH, L, DH) -> (B*L, H)
    return x4d.transpose(0, 2, 1, 3).reshape(B * L, H)


def net_forward(params, input_ids, attention_mask, token_type_ids):
    maskf = attention_mask.astype(F32)

    # --- BERT embeddings ---
    emb = (params["word_emb"][input_ids]
           + params["pos_emb"][jnp.arange(L)][None, :, :]
           + params["type_emb"][token_type_ids])                      # (B, L, H)
    h2d = layernorm(emb.reshape(B * L, H), params["emb_ln_g"], params["emb_ln_b"])

    # additive attention-mask bias, shared across heads: (B, 1, L)
    bias = ((1.0 - maskf) * (-10000.0)).reshape(B, 1, L)
    scale = 1.0 / math.sqrt(DH)

    # --- BERT encoder layers ---
    for lyr in params["layers"]:
        qkv = dense(h2d, lyr["wqkv"], lyr["bqkv"])                    # fused QKV (M, 3H)
        q, k, v = qkv[:, :H], qkv[:, H:2 * H], qkv[:, 2 * H:]
        ctx = attention(split_heads(q), split_heads(k), split_heads(v), bias, scale)
        h2d = dense_add_ln(merge_heads(ctx), lyr["wo"], lyr["bo"],
                           h2d, lyr["ln1_g"], lyr["ln1_b"])           # proj+res+LN fused
        ffn = dense(h2d, lyr["w1"], lyr["b1"], gelu=True)
        h2d = dense_add_ln(ffn, lyr["w2"], lyr["b2"],
                           h2d, lyr["ln2_g"], lyr["ln2_b"])           # proj+res+LN fused

    last_hidden = h2d.reshape(B, L, H)

    # --- Biaffine head (Position=abPosition -> add sinusoidal position embedding) ---
    last_hidden = last_hidden + sinusoidal_position_embedding(L, H)[None, :, :]
    logits = biaffine_head(last_hidden, maskf, params["bi_w"], params["bi_b"])
    return logits                                                     # (B, C, L, L)


if __name__ == "__main__":
    key = jax.random.PRNGKey(0)
    kp, ki = jax.random.split(key)
    params = init_params(kp)

    input_ids = jax.random.randint(ki, (B, L), 0, VOCAB, dtype=jnp.int32)
    attention_mask = jnp.array([[1, 1, 1, 1, 1, 1, 1, 1],
                                [1, 1, 1, 1, 1, 0, 0, 0]], dtype=jnp.int32)
    token_type_ids = jnp.zeros((B, L), dtype=jnp.int32)

    logits = net_forward(params, input_ids, attention_mask, token_type_ids)
    logits = jax.block_until_ready(logits)
    assert logits.shape == (B, C, L, L)
    assert bool(jnp.all(jnp.isfinite(logits[:, :, 0, 0])))
    print("KERNEL_OK")
</pallas_src>

<mosaic_0001>
module attributes {stable_mosaic.version = 11 : i64} {
  func.func @_ln_kernel(%arg0: i32, %arg1: memref<8x32xf32, #tpu.memory_space<vmem>>, %arg2: memref<1x32xf32, #tpu.memory_space<vmem>>, %arg3: memref<1x32xf32, #tpu.memory_space<vmem>>, %arg4: memref<8x32xf32, #tpu.memory_space<vmem>>) attributes {dimension_semantics = [#tpu.dimension_semantics<parallel>], iteration_bounds = array<i64: 2>, scalar_prefetch = 0 : i64, scratch_operands = 0 : i64, tpu.core_type = #tpu.core_type<tc>, window_params = [{transform_indices = @transform_0, window_bounds = array<i64: 8, 32>}, {pipeline_mode = #tpu.pipeline_mode<synchronous>, transform_indices = @transform_1, window_bounds = array<i64: 1, 32>}, {pipeline_mode = #tpu.pipeline_mode<synchronous>, transform_indices = @transform_2, window_bounds = array<i64: 1, 32>}, {transform_indices = @transform_3, window_bounds = array<i64: 8, 32>}]} {
    %c0 = arith.constant 0 : index
    %c0_0 = arith.constant 0 : index
    %0 = vector.load %arg1[%c0, %c0_0] : memref<8x32xf32, #tpu.memory_space<vmem>>, vector<8x32xf32>
    %cst = arith.constant dense<0.000000e+00> : vector<8xf32>
    %1 = vector.multi_reduction <add>, %0, %cst [1] : vector<8x32xf32> to vector<8xf32>
    %2 = vector.shape_cast %1 : vector<8xf32> to vector<8x1xf32>
    %cst_1 = arith.constant 3.200000e+01 : f32
    %3 = vector.broadcast %cst_1 : f32 to vector<8x1xf32>
    %4 = arith.divf %2, %3 : vector<8x1xf32>
    %5 = vector.broadcast %4 : vector<8x1xf32> to vector<8x32xf32>
    %6 = arith.subf %0, %5 : vector<8x32xf32>
    %7 = arith.mulf %6, %6 : vector<8x32xf32>
    %cst_2 = arith.constant dense<0.000000e+00> : vector<8xf32>
    %8 = vector.multi_reduction <add>, %7, %cst_2 [1] : vector<8x32xf32> to vector<8xf32>
    %9 = vector.shape_cast %8 : vector<8xf32> to vector<8x1xf32>
    %cst_3 = arith.constant 3.200000e+01 : f32
    %10 = vector.broadcast %cst_3 : f32 to vector<8x1xf32>
    %11 = arith.divf %9, %10 : vector<8x1xf32>
    %12 = vector.broadcast %4 : vector<8x1xf32> to vector<8x32xf32>
    %13 = arith.subf %0, %12 : vector<8x32xf32>
    %cst_4 = arith.constant 9.99999996E-13 : f32
    %14 = vector.broadcast %cst_4 : f32 to vector<8x1xf32>
    %15 = arith.addf %11, %14 : vector<8x1xf32>
    %16 = math.rsqrt %15 : vector<8x1xf32>
    %17 = vector.broadcast %16 : vector<8x1xf32> to vector<8x32xf32>
    %18 = arith.mulf %13, %17 : vector<8x32xf32>
    %c0_5 = arith.constant 0 : index
    %c0_6 = arith.constant 0 : index
    %19 = vector.load %arg2[%c0_5, %c0_6] : memref<1x32xf32, #tpu.memory_space<vmem>>, vector<1x32xf32>
    %20 = vector.broadcast %19 : vector<1x32xf32> to vector<8x32xf32>
    %21 = arith.mulf %18, %20 : vector<8x32xf32>
    %c0_7 = arith.constant 0 : index
    %c0_8 = arith.constant 0 : index
    %22 = vector.load %arg3[%c0_7, %c0_8] : memref<1x32xf32, #tpu.memory_space<vmem>>, vector<1x32xf32>
    %23 = vector.broadcast %22 : vector<1x32xf32> to vector<8x32xf32>
    %24 = arith.addf %21, %23 : vector<8x32xf32>
    %c0_9 = arith.constant 0 : index
    %c0_10 = arith.constant 0 : index
    %25 = vector.load %arg4[%c0_9, %c0_10] : memref<8x32xf32, #tpu.memory_space<vmem>>, vector<8x32xf32>
    tpu.vector_store %arg4[%c0_9, %c0_10], %24 {strides = array<i32>} : memref<8x32xf32, #tpu.memory_space<vmem>>, vector<8x32xf32>,
    return
  }
  func.func @transform_0(%arg0: i32) -> (i32, i32) {
    %c0_i32 = arith.constant 0 : i32
    %c0_i32_0 = arith.constant 0 : i32
    return %arg0, %c0_i32 : i32, i32
  }
  func.func @transform_1(%arg0: i32) -> (i32, i32) {
    %c0_i32 = arith.constant 0 : i32
    %c0_i32_0 = arith.constant 0 : i32
    %c0_i32_1 = arith.constant 0 : i32
    return %c0_i32, %c0_i32_0 : i32, i32
  }
  func.func @transform_2(%arg0: i32) -> (i32, i32) {
    %c0_i32 = arith.constant 0 : i32
    %c0_i32_0 = arith.constant 0 : i32
    %c0_i32_1 = arith.constant 0 : i32
    return %c0_i32, %c0_i32_0 : i32, i32
  }
  func.func @transform_3(%arg0: i32) -> (i32, i32) {
    %c0_i32 = arith.constant 0 : i32
    %c0_i32_0 = arith.constant 0 : i32
    return %arg0, %c0_i32 : i32, i32
  }
}

</mosaic_0001>

<bundles_post_ra>
// kernel: tpu_custom_call.1
= control target key start
LH: loop header
LB: loop body
LE: loop exit
PB: predicated region body
PF: predicated region fallthrough
CT: control target
= control target key end

     0   :  { %8 = vsyncpa [#allocation3], 0  ;;  %s655_s0 = inlined_call_operand.hbm [shape: f32[16,32], index: 0, kind: input, shape index: {}]   ;;  %s656_s1 = inlined_call_operand.vmem [shape: f32[1,32], index: 1, kind: input, shape index: {}]   ;;  %s657_s2 = inlined_call_operand.vmem [shape: f32[1,32], index: 2, kind: input, shape index: {}]   ;;  %s658_s3 = inlined_call_operand.hbm [shape: f32[16,32], index: 3, kind: output, shape index: {}]  }
   0x1   :  { %10 = vsyncpa [#allocation3 + $0x1], 0 }
   0x2   :  { %11 = vsyncpa [#allocation4], 0 }
   0x3   :  { %13 = vsyncpa [#allocation4 + $0x1], 0  ;;  %s485_s12 = smov 0   ;;  %s487_s13 = smov 0  }
   0x4   :  { %s489_s14 = smov 0   ;;  %s491_s15 = smov 0  }
   0x5 LB: > { %s506_s16 = sadd.s32 4294967295, %s461_s15   ;;  %s303_s17 = sadd.s32 4294967294, %s461_s15   ;;  %s461_s15 = sphi %s491_s15, %s673_s15   ;;  %s457_s14 = sphi %s489_s14, %s672_s14   ;;  %s453_s13 = sphi %s487_s13, %s671_s13   ;;  %s449_s12 = sphi %s485_s12, %s670_s12  }
   0x6   : > { %s510_s18 = sadd.s32 1, %s461_s15   ;;  %s26_s19 = sadd.s32 1, %s457_s14 }
   0x7   : > { %s23_s20 = ssub.s32 %s461_s15, %s510_s18  ;;  %p33_p0 = scmp.ne.s32.totalorder %s457_s14, %s453_s13 }
   0x8   : > { %p24_p1 = scmp.eq.s32.totalorder %s23_s20, 0  ;;  %p34_p2 = scmp.eq.s32.totalorder %s461_s15, 0 }
   0x9   : > { %p39_p3 = scmp.ne.s32.totalorder %s453_s13, %s449_s12  ;;  %p40_p4 = scmp.eq.s32.totalorder %s506_s16, 0 }
   0xa   : > { %s522_s21 = scalar_select %p24_p1, %s457_s14, %s26_s19  }
   0xb   : > { %p524_p5 = por %p34_p2, %p33_p0  ;;  %p528_p6 = por %p40_p4, %p39_p3 }
   0xc   : > { %p105_p7 = scmp.eq.s32.totalorder %s506_s16, 1  ;;  %p111_p8 = scmp.eq.s32.totalorder %s303_s17, 1 }
   0xd   : > { %p329_p10 = scmp.lt.s32.totalorder %s461_s15, 2  ;;  %s137_s26 = sand.u32 1, %s457_s14  }
   0xe   : > { %p535_p11 = por %p105_p7, %p33_p0  ;;  %p539_p12 = por %p111_p8, %p39_p3 }
   0xf   : > { %s307_s27 = sshll.u32 %s461_s15, 7  ;;  %s306_s28 = sshll.u32 %s137_s26, 3 }
  0x10   : > { %s662_s24 = scalar_select %p535_p11, 1, 0 }
  0x11   : > { %s663_s25 = scalar_select %p539_p12, 1, 0 }
  0x12   : > { %s548_s4 = scalar_lea.hbm %s655_s0, %s307_s27  ;;  %s141_s5 = scalar_lea.vmem [#allocation2], %s306_s28 }
  0x13   : > { %s148_s6 = sshll.u32 %s141_s5, 4  ;;  %p552_p13 = pnand %p329_p10, %p524_p5  ;;  %s556_s6 = int_to_ptr.vmem [resolvable:$true] %s148_s6 }
  0x14   : > { %s138_s8 = scalar_lea.sflag [#allocation3], %s137_s26  ;;  %s365_s9 = scalar_lea.hbm %s548_s4, 128 }
  0x15   : > { %p366_p2 = scmp.ne.s32.totalorder %s548_s4, %s365_s9  ;;  %p367_p3 = pneg %p552_p13 }
  0x16   : > { %s370_s17 = scalar_lea.hbm %s655_s0, 256  ;;  %p371_p5 = scmp.lt.u32.totalorder %s548_s4, %s655_s0 }
  0x17   : > { %p368_p4 = pnand %p367_p3, %p366_p2  ;;  %p372_p8 = scmp.lt.u32.totalorder %s370_s17, %s365_s9 }
  0x18   : > { %p374_p9 = scmp.lt.u32.totalorder %s365_s9, %s548_s4 }
  0x19   : > { %p369_p7 = pneg %p368_p4  ;;  %p373_p10 = por %p372_p8, %p371_p5 }
  0x1b   : > { %p375_p0 = por %p374_p9, %p373_p10 }
  0x1d   : > { %p376_p1 = pnand %p375_p0, %p369_p7 }
  0x1f   : > { %379 = shalt.err (!%p376_p1)
}
  0x20   : > { %s380_s22 = scalar_lea.vmem %s556_s6, 128  ;;  %s463_s26 = smov [#allocation2]  }
  0x21   : > { %p381_p2 = scmp.ne.s32.totalorder %s556_s6, %s380_s22  ;;  %s385_s27 = sshll.u32 %s463_s26, 4  ;;  %s386_s27 = int_to_ptr.vmem [resolvable:$false] %s385_s27 }
  0x22   : > { %s387_s28 = scalar_lea.vmem %s386_s27, 256  ;;  %p388_p11 = scmp.lt.s32.totalorder %s556_s6, %s386_s27 }
  0x23   : > { %p383_p4 = pnand %p381_p2, %p367_p3  ;;  %p389_p5 = scmp.lt.s32.totalorder %s387_s28, %s380_s22 }
  0x25   : > { %p384_p12 = pneg %p383_p4  ;;  %p390_p8 = por %p389_p5, %p388_p11 }
  0x27   : > { %p391_p9 = pnand %p390_p8, %p384_p12 }
  0x29   : > { %394 = shalt.err (!%p391_p9)
}
  0x2a   : > { %324 = dma.hbm_to_vmem [thread:$0]  (!%p552_p13), %s548_s4, 128, %s556_s6, %s138_s8  }
  0x2b   : > { %p665_p0 = scmp.lt.s32.totalorder %s461_s15, 3  ;;  %p666_p1 = scmp.ge.s32.totalorder %s461_s15, 1 }
  0x2d   : > { %p154_p3 = pnand %p666_p1, %p665_p0 }
  0x2e   : > { %s590_s29 = sand.u32 (!%p154_p3), 1, %s453_s13  }
  0x2f   : > { %157 = sbr.rel (%p154_p3) target bundleno = 383 (0x17f), region = 32  ;;  %s309_s30 = sshll.u32 (!%p154_p3), %s590_s29, 3 }
  0x30   : > { %s160_s5 = scalar_lea.sflag (!%p154_p3), [#allocation3], %s590_s29  ;;  %s163_s9 = scalar_lea.vmem (!%p154_p3), [#allocation2], %s309_s30 }
  0x36   : > { %440 = dma.done.wait (%p528_p6), %s160_s5, 128  }
  0x37   : > { %442 = vsyncadd (%p528_p6), %s160_s5, 4294967168  ;;  %vm187_vm0 = vcmask 261120   ;;  %v186_v0 = vld [vmem:[%s163_s9] sm:$0xff]  ;;  %s314_s8 = sshll.u32 %s506_s16, 7  ;;  %s185_s10 = scalar_lea.vmem [#allocation5], %s309_s30 }
  0x38   : > { %v188_v1 = vsel %vm187_vm0, %v186_v0, 0.0  ;;  %v311_v11 = vld [vmem:[%s656_s1] ss:$0 sm:$0xff]  ;;  %s233_s11 = sshll.u32 %s185_s10, 4  ;;  %s610_s20 = scalar_lea.hbm %s658_s3, %s314_s8  ;;  %s612_s11 = int_to_ptr.vmem [resolvable:$true] %s233_s11 }
  0x39   : > { %189 = vadd.xlane.f32.xlu0 %v188_v1  ;;  %v312_v13 = vld [vmem:[%s657_s2] ss:$0 sm:$0xff]  ;;  %s220_s22 = scalar_lea.sflag [#allocation4], %s590_s29  ;;  %s395_s26 = scalar_lea.vmem %s612_s11, 128 }
  0x3a   : > { %p396_p6 = scmp.ne.s32.totalorder %s612_s11, %s395_s26  ;;  %p667_p11 = scmp.ne.s32.totalorder %s662_s24, 0 }
  0x3b   : > { %s464_s16 = smov [#allocation5]  }
  0x3c   : > { %p397_p12 = pnand %p396_p6, %p667_p11  ;;  %s399_s27 = sshll.u32 %s464_s16, 4  ;;  %s400_s27 = int_to_ptr.vmem [resolvable:$false] %s399_s27 }
  0x3d   : > { %s401_s28 = scalar_lea.vmem %s400_s27, 256  ;;  %p402_p7 = scmp.lt.s32.totalorder %s612_s11, %s400_s27 }
  0x3e   : > { %p398_p13 = pneg %p397_p12  ;;  %p403_p10 = scmp.lt.s32.totalorder %s401_s28, %s395_s26 }
  0x40   : > { %p404_p2 = por %p403_p10, %p402_p7 }
  0x42   : > { %p405_p4 = pnand %p404_p2, %p398_p13 }
  0xc6   : > { %v190_v2 = vpop.xlane.xlu0 %189 }
  0xc7   : > { %v192_v3 = vmul.f32 0.03125, %v190_v2 }
  0xc9   : > { %v193_v4 = vsub.f32 %v186_v0, %v192_v3 }
  0xcb   : > { %v194_v5 = vmul.f32 %v193_v4, %v193_v4 }
  0xcd   : > { %v195_v6 = vsel %vm187_vm0, %v194_v5, 0.0 }
  0xce   : > { %196 = vadd.xlane.f32.xlu0 %v195_v6 }
 0x15b   : > { %v197_v7 = vpop.xlane.xlu0 %196 }
 0x15c   : > { %v198_v8 = vmul.f32 0.03125, %v197_v7 }
 0x15e   : > { %v199_v9 = vadd.f32 1e-12, %v198_v8 }
 0x160   : > { %363 = vrsqrt.f32 %v199_v9 }
 0x16a   : > { %v364_v10 = vpop.eup %363 }
 0x16b   : > { %v201_v12 = vmul.f32 %v364_v10, %v193_v4 }
 0x16d   : > { %v209_v14 = vmul.f32 %v311_v11, %v201_v12 }
 0x16f   : > { %v217_v15 = vadd.f32 %v312_v13, %v209_v14 }
 0x171   : > { %218 = vst.msk [vmem:[%s185_s10] sm:$0xff] %vm187_vm0, %v217_v15 }
 0x172   : > { %408 = shalt.err (!%p405_p4)
}
 0x173   : > { %s409_s29 = scalar_lea.hbm %s610_s20, 128  ;;  %s413_s9 = scalar_lea.hbm %s658_s3, 256 }
 0x174   : > { %p410_p5 = scmp.ne.s32.totalorder %s610_s20, %s409_s29  ;;  %p414_p0 = scmp.lt.u32.totalorder %s610_s20, %s658_s3 }
 0x175   : > { %p415_p1 = scmp.lt.u32.totalorder %s413_s9, %s409_s29  ;;  %p417_p6 = scmp.lt.u32.totalorder %s409_s29, %s610_s20 }
 0x176   : > { %p411_p8 = pnand %p410_p5, %p667_p11 }
 0x177   : > { %p416_p3 = por %p415_p1, %p414_p0 }
 0x178   : > { %p412_p9 = pneg %p411_p8 }
 0x179   : > { %p418_p12 = por %p417_p6, %p416_p3 }
 0x17b   : > { %p419_p13 = pnand %p418_p12, %p412_p9 }
 0x17d   : > { %422 = shalt.err (!%p419_p13)
}
 0x17e   : > { %319 = dma.vmem_to_hbm [thread:$0]  (%p667_p11), %s612_s11, 128, %s610_s20, %s220_s22  }
 0x17f PF: > { %s245_s6 = sand.u32 1, %s449_s12   ;;  %p668_p7 = scmp.ne.s32.totalorder %s663_s25, 0 }
 0x180   : > { %p669_p10 = scmp.ge.s32.totalorder %s461_s15, 2  ;;  %s246_s7 = scalar_lea.sflag [#allocation4], %s245_s6 }
 0x182   : > { %p326_p2 = pnand %p669_p10, %p668_p7 }
 0x184   : > { %444 = dma.done.wait (!%p326_p2), %s246_s7, 128  }
 0x185   : > { %446 = vsyncadd (!%p326_p2), %s246_s7, 4294967168  ;;  %p16_p4 = scmp.ge.s32.totalorder %s510_s18, 4   ;;  %s670_s12 = smov %s453_s13 }
 0x186   : > { %s671_s13 = smov %s457_s14  ;;  %s672_s14 = smov %s522_s21 }
 0x187   : > { %s673_s15 = smov %s510_s18  ;;  %18 = sbr.rel (!%p16_p4) target bundleno = 5 (0x5), region = 77 }
 0x18e   :  { %251 = vsyncpa [#allocation3], 1 }
 0x18f   :  { %253 = vsyncpa [#allocation3 + $0x1], 1 }
 0x190   :  { %254 = vsyncpa [#allocation4], 1 }
 0x191   :  { %256 = vsyncpa [#allocation4 + $0x1], 1 }

</bundles_post_ra>
